<compile_context>
chip_gen: v7x
topology: tpu7x:2x2x1
jax: 0.10.0
libtpu: 0.0.40
codegen_flags: <defaults>
</compile_context>

<pallas_src>
import jax
import jax.numpy as jnp
from jax import lax
from jax.experimental import pallas as pl
from jax.experimental.pallas import tpu as pltpu

LN_EPS = 1e-5          # PyTorch nn.LayerNorm default
LEAKY_SLOPE = 0.1      # nn.LeakyReLU(0.1)

_PARAM_ORDER = (
    "w1", "b1", "g1", "be1",
    "wr1", "br1", "gr1", "ber1",
    "wr2", "br2", "gr2", "ber2",
    "w2", "b2", "g2", "be2",
    "w3", "b3",
)


def _round_up(x, m):
    return (x + m - 1) // m * m


def _sublane(dtype):
    # second-minor tiling granularity per element width
    return {4: 8, 2: 16, 1: 32}.get(jnp.dtype(dtype).itemsize, 8)


def _choose_tb(batch, tb, sub):
    # At least 2 grid steps when the batch is big enough so the "parallel"
    # batch axis can be split across v7x's two TensorCores.
    half = _round_up(pl.cdiv(max(batch, 1), 2), sub)
    return _round_up(max(min(tb, half), sub), sub)


def _ln_leaky(hfull, dim, gamma, beta):
    """LayerNorm(+LeakyReLU) where hfull[:, dim] already holds the row sum
    (computed for free by an extra MXU weight column)."""
    h = hfull[:, :dim]
    mu = hfull[:, dim:dim + 1] * (1.0 / dim)      # mean from the matmul column
    centered = h - mu
    var = jnp.mean(centered * centered, axis=-1, keepdims=True)   # one XLU reduce
    y = centered * lax.rsqrt(var + LN_EPS) * gamma + beta         # rsqrt -> EUP
    return jnp.where(y >= 0, y, LEAKY_SLOPE * y)


def net_kernel(
    x_ref,
    w1_ref, b1_ref, g1_ref, be1_ref,
    wr1_ref, br1_ref, gr1_ref, ber1_ref,
    wr2_ref, br2_ref, gr2_ref, ber2_ref,
    w2_ref, b2_ref, g2_ref, be2_ref,
    w3_ref, b3_ref,
    out_ref,
):
    # fc1 -> LN -> LeakyReLU   (dropout1 is identity at inference)
    x = x_ref[...].astype(jnp.bfloat16)
    hf = jnp.dot(x, w1_ref[...], preferred_element_type=jnp.float32) + b1_ref[...]
    h = _ln_leaky(hf, 128, g1_ref[...], be1_ref[...])
    # TODO(synk): dropout (p=0.3) omitted — inference-mode identity.

    # res_block1: fc -> LN -> LeakyReLU -> (dropout) -> + residual
    hf = jnp.dot(h.astype(jnp.bfloat16), wr1_ref[...],
                 preferred_element_type=jnp.float32) + br1_ref[...]
    h = _ln_leaky(hf, 128, gr1_ref[...], ber1_ref[...]) + h

    # res_block2
    hf = jnp.dot(h.astype(jnp.bfloat16), wr2_ref[...],
                 preferred_element_type=jnp.float32) + br2_ref[...]
    h = _ln_leaky(hf, 128, gr2_ref[...], ber2_ref[...]) + h

    # fc2 -> LN -> LeakyReLU   (dropout2 is identity at inference)
    hf = jnp.dot(h.astype(jnp.bfloat16), w2_ref[...],
                 preferred_element_type=jnp.float32) + b2_ref[...]
    h = _ln_leaky(hf, 64, g2_ref[...], be2_ref[...])

    # fc3 — output lane-padded to a multiple of 128 (unmasked vst)
    out = jnp.dot(h.astype(jnp.bfloat16), w3_ref[...],
                  preferred_element_type=jnp.float32) + b3_ref[...]
    out_ref[...] = out.astype(out_ref.dtype)


def _prepare_params(params, out_pad):
    """Pack weights for the kernel:
      * LN-feeding weights get an extra column holding the row-sum (W @ 1) and
        the bias gets sum(b) there, so the LN mean falls out of the matmul.
      * matmul weights cast to bf16 once; biases / LN affine stay f32.
      * fc3 weights/bias lane-padded to out_pad."""
    p = {k: jnp.asarray(v, jnp.float32) for k, v in params.items()}

    def pack(w, b, n_pad):
        k, n = w.shape
        wp = jnp.zeros((k, n_pad), jnp.float32).at[:, :n].set(w)
        wp = wp.at[:, n].set(jnp.sum(w, axis=1))
        bp = jnp.zeros((1, n_pad), jnp.float32).at[:, :n].set(b)
        bp = bp.at[0, n].set(jnp.sum(b))
        return wp.astype(jnp.bfloat16), bp

    prep = {}
    prep["w1"], prep["b1"] = pack(p["w1"], p["b1"], 256)
    prep["wr1"], prep["br1"] = pack(p["wr1"], p["br1"], 256)
    prep["wr2"], prep["br2"] = pack(p["wr2"], p["br2"], 256)
    prep["w2"], prep["b2"] = pack(p["w2"], p["b2"], 128)
    for name in ("g1", "be1", "gr1", "ber1", "gr2", "ber2", "g2", "be2"):
        prep[name] = p[name]

    w3, b3 = p["w3"], p["b3"]
    out_dim = w3.shape[1]
    if out_pad != out_dim:
        w3 = jnp.pad(w3, ((0, 0), (0, out_pad - out_dim)))
        b3 = jnp.pad(b3, ((0, 0), (0, out_pad - out_dim)))
    prep["w3"] = w3.astype(jnp.bfloat16)
    prep["b3"] = b3
    return prep


def net_forward(x, params, *, tb=1024, out_dtype=None, trim_output=True):
    B, in_dim = x.shape
    out_dim = params["w3"].shape[1]
    out_pad = max(128, _round_up(out_dim, 128))
    out_dtype = x.dtype if out_dtype is None else jnp.dtype(out_dtype)

    # Batch tile: multiple of the sublane granularity of the streamed dtypes,
    # capped so the batch grid has >= 2 steps when B is large enough.
    sub = max(_sublane(x.dtype), _sublane(out_dtype))
    TB = _choose_tb(B, tb, sub)
    B_pad = _round_up(B, TB)
    if B_pad != B:
        x = jnp.pad(x, ((0, B_pad - B), (0, 0)))   # padded rows sliced off below

    prepared = _prepare_params(params, out_pad)
    operands = (x,) + tuple(prepared[name] for name in _PARAM_ORDER)

    grid = (B_pad // TB,)
    x_spec = pl.BlockSpec((TB, in_dim), lambda i: (i, 0))

    def const_spec(shape):
        # Constant index_map -> parameters stay resident in VMEM across steps.
        return pl.BlockSpec(shape, lambda i: (0, 0))

    param_specs = [const_spec(prepared[name].shape) for name in _PARAM_ORDER]
    out_spec = pl.BlockSpec((TB, out_pad), lambda i: (i, 0))

    param_bytes = sum(int(prepared[name].nbytes) for name in _PARAM_ORDER)
    flops = 2 * B_pad * (in_dim * 256 + 128 * 256 + 128 * 256
                         + 128 * 128 + 64 * out_pad)
    cost = pl.CostEstimate(
        flops=flops,
        transcendentals=4 * B_pad,                       # one rsqrt per row per LN
        bytes_accessed=(param_bytes + int(x.nbytes)
                        + B_pad * out_pad * out_dtype.itemsize),
    )

    cp_kwargs = dict(dimension_semantics=("parallel",))  # megacore shard on v7x
    if TB > 1024:
        cp_kwargs["vmem_limit_bytes"] = 64 * 1024 * 1024

    out = pl.pallas_call(
        net_kernel,
        out_shape=jax.ShapeDtypeStruct((B_pad, out_pad), out_dtype),
        grid=grid,
        in_specs=[x_spec] + param_specs,
        out_specs=out_spec,
        compiler_params=pltpu.CompilerParams(**cp_kwargs),
        cost_estimate=cost,
    )(*operands)

    if trim_output:
        return out[:B, :out_dim]
    if B_pad != B:
        return out[:B]
    return out  # lane-padded (B, out_pad) — cheapest for downstream fusion


def init_params(key, input_dim, output_dim):
    """Deterministic synthetic parameters matching Net.__init__ shapes."""
    ks = jax.random.split(key, 10)

    def linear(k, fan_in, fan_out):
        kw, kb = jax.random.split(k)
        lim = 1.0 / jnp.sqrt(fan_in)
        w = jax.random.uniform(kw, (fan_in, fan_out), jnp.float32, -lim, lim)
        b = jax.random.uniform(kb, (1, fan_out), jnp.float32, -lim, lim)
        return w, b

    p = {}
    p["w1"], p["b1"] = linear(ks[0], input_dim, 128)
    p["g1"], p["be1"] = jnp.ones((1, 128), jnp.float32), jnp.zeros((1, 128), jnp.float32)

    p["wr1"], p["br1"] = linear(ks[1], 128, 128)
    p["gr1"], p["ber1"] = jnp.ones((1, 128), jnp.float32), jnp.zeros((1, 128), jnp.float32)

    p["wr2"], p["br2"] = linear(ks[2], 128, 128)
    p["gr2"], p["ber2"] = jnp.ones((1, 128), jnp.float32), jnp.zeros((1, 128), jnp.float32)

    p["w2"], p["b2"] = linear(ks[3], 128, 64)
    p["g2"], p["be2"] = jnp.ones((1, 64), jnp.float32), jnp.zeros((1, 64), jnp.float32)

    p["w3"], p["b3"] = linear(ks[4], 64, output_dim)
    return p


def net_reference(x, p):
    """Pure-JAX reference with matching bf16-matmul / f32-elementwise numerics."""
    def ln(h, g, b):
        mu = jnp.mean(h, axis=-1, keepdims=True)
        var = jnp.mean((h - mu) ** 2, axis=-1, keepdims=True)
        return (h - mu) / jnp.sqrt(var + LN_EPS) * g + b

    def act(h):
        return jnp.where(h >= 0, h, LEAKY_SLOPE * h)

    def mm(a, w):
        return jnp.dot(a.astype(jnp.bfloat16), w.astype(jnp.bfloat16),
                       preferred_element_type=jnp.float32)

    h = act(ln(mm(x, p["w1"]) + p["b1"], p["g1"], p["be1"]))
    h = act(ln(mm(h, p["wr1"]) + p["br1"], p["gr1"], p["ber1"])) + h
    h = act(ln(mm(h, p["wr2"]) + p["br2"], p["gr2"], p["ber2"])) + h
    h = act(ln(mm(h, p["w2"]) + p["b2"], p["g2"], p["be2"]))
    return mm(h, p["w3"]) + p["b3"]


if __name__ == "__main__":
    key = jax.random.PRNGKey(0)
    k_param, k_x, k_x2 = jax.random.split(key, 3)

    batch, input_dim, output_dim = 8, 32, 16
    params = init_params(k_param, input_dim, output_dim)

    # Small single-tile case.
    x = jax.random.normal(k_x, (batch, input_dim), jnp.float32)
    out = net_forward(x, params)
    jax.block_until_ready(out)
    ref = net_reference(x, params)
    assert out.shape == (batch, output_dim)
    assert jnp.allclose(out, ref, atol=2e-2, rtol=2e-2), "mismatch vs reference"

    # Multi-step grid + batch-padding path (3 grid steps with tb=16).
    x2 = jax.random.normal(k_x2, (40, input_dim), jnp.float32)
    out2 = net_forward(x2, params, tb=16)
    jax.block_until_ready(out2)
    ref2 = net_reference(x2, params)
    assert out2.shape == (40, output_dim)
    assert jnp.allclose(out2, ref2, atol=2e-2, rtol=2e-2), "mismatch vs reference (grid)"

    print("KERNEL_OK")
</pallas_src>

<mosaic_0001>
module attributes {stable_mosaic.version = 11 : i64} {
  func.func @net_kernel(%arg0: i32, %arg1: memref<8x32xf32, #tpu.memory_space<vmem>>, %arg2: memref<32x256xbf16, #tpu.memory_space<vmem>>, %arg3: memref<1x256xf32, #tpu.memory_space<vmem>>, %arg4: memref<1x128xf32, #tpu.memory_space<vmem>>, %arg5: memref<1x128xf32, #tpu.memory_space<vmem>>, %arg6: memref<128x256xbf16, #tpu.memory_space<vmem>>, %arg7: memref<1x256xf32, #tpu.memory_space<vmem>>, %arg8: memref<1x128xf32, #tpu.memory_space<vmem>>, %arg9: memref<1x128xf32, #tpu.memory_space<vmem>>, %arg10: memref<128x256xbf16, #tpu.memory_space<vmem>>, %arg11: memref<1x256xf32, #tpu.memory_space<vmem>>, %arg12: memref<1x128xf32, #tpu.memory_space<vmem>>, %arg13: memref<1x128xf32, #tpu.memory_space<vmem>>, %arg14: memref<128x128xbf16, #tpu.memory_space<vmem>>, %arg15: memref<1x128xf32, #tpu.memory_space<vmem>>, %arg16: memref<1x64xf32, #tpu.memory_space<vmem>>, %arg17: memref<1x64xf32, #tpu.memory_space<vmem>>, %arg18: memref<64x128xbf16, #tpu.memory_space<vmem>>, %arg19: memref<1x128xf32, #tpu.memory_space<vmem>>, %arg20: memref<8x128xf32, #tpu.memory_space<vmem>>) attributes {dimension_semantics = [#tpu.dimension_semantics<parallel>], iteration_bounds = array<i64: 1>, scalar_prefetch = 0 : i64, scratch_operands = 0 : i64, tpu.core_type = #tpu.core_type<tc>, window_params = [{transform_indices = @transform_0, window_bounds = array<i64: 8, 32>}, {pipeline_mode = #tpu.pipeline_mode<synchronous>, transform_indices = @transform_1, window_bounds = array<i64: 32, 256>}, {pipeline_mode = #tpu.pipeline_mode<synchronous>, transform_indices = @transform_2, window_bounds = array<i64: 1, 256>}, {pipeline_mode = #tpu.pipeline_mode<synchronous>, transform_indices = @transform_3, window_bounds = array<i64: 1, 128>}, {pipeline_mode = #tpu.pipeline_mode<synchronous>, transform_indices = @transform_4, window_bounds = array<i64: 1, 128>}, {pipeline_mode = #tpu.pipeline_mode<synchronous>, transform_indices = @transform_5, window_bounds = array<i64: 128, 256>}, {pipeline_mode = #tpu.pipeline_mode<synchronous>, transform_indices = @transform_6, window_bounds = array<i64: 1, 256>}, {pipeline_mode = #tpu.pipeline_mode<synchronous>, transform_indices = @transform_7, window_bounds = array<i64: 1, 128>}, {pipeline_mode = #tpu.pipeline_mode<synchronous>, transform_indices = @transform_8, window_bounds = array<i64: 1, 128>}, {pipeline_mode = #tpu.pipeline_mode<synchronous>, transform_indices = @transform_9, window_bounds = array<i64: 128, 256>}, {pipeline_mode = #tpu.pipeline_mode<synchronous>, transform_indices = @transform_10, window_bounds = array<i64: 1, 256>}, {pipeline_mode = #tpu.pipeline_mode<synchronous>, transform_indices = @transform_11, window_bounds = array<i64: 1, 128>}, {pipeline_mode = #tpu.pipeline_mode<synchronous>, transform_indices = @transform_12, window_bounds = array<i64: 1, 128>}, {pipeline_mode = #tpu.pipeline_mode<synchronous>, transform_indices = @transform_13, window_bounds = array<i64: 128, 128>}, {pipeline_mode = #tpu.pipeline_mode<synchronous>, transform_indices = @transform_14, window_bounds = array<i64: 1, 128>}, {pipeline_mode = #tpu.pipeline_mode<synchronous>, transform_indices = @transform_15, window_bounds = array<i64: 1, 64>}, {pipeline_mode = #tpu.pipeline_mode<synchronous>, transform_indices = @transform_16, window_bounds = array<i64: 1, 64>}, {pipeline_mode = #tpu.pipeline_mode<synchronous>, transform_indices = @transform_17, window_bounds = array<i64: 64, 128>}, {pipeline_mode = #tpu.pipeline_mode<synchronous>, transform_indices = @transform_18, window_bounds = array<i64: 1, 128>}, {transform_indices = @transform_19, window_bounds = array<i64: 8, 128>}]} {
    %c0 = arith.constant 0 : index
    %c0_0 = arith.constant 0 : index
    %0 = vector.load %arg1[%c0, %c0_0] : memref<8x32xf32, #tpu.memory_space<vmem>>, vector<8x32xf32>
    %1 = arith.truncf %0 : vector<8x32xf32> to vector<8x32xbf16>
    %c0_1 = arith.constant 0 : index
    %c0_2 = arith.constant 0 : index
    %2 = vector.load %arg2[%c0_1, %c0_2] : memref<32x256xbf16, #tpu.memory_space<vmem>>, vector<32x256xbf16>
    %cst = arith.constant dense<0.000000e+00> : vector<8x256xf32>
    %3 = tpu.matmul %1, %2, %cst {dimension_numbers = #tpu.dot_dimension_numbers<[1], [0], [0], [1], [0, 0, 1, 1], [], []>} : vector<8x32xbf16>, vector<32x256xbf16>, vector<8x256xf32> -> vector<8x256xf32>
    %c0_3 = arith.constant 0 : index
    %c0_4 = arith.constant 0 : index
    %4 = vector.load %arg3[%c0_3, %c0_4] : memref<1x256xf32, #tpu.memory_space<vmem>>, vector<1x256xf32>
    %5 = vector.broadcast %4 : vector<1x256xf32> to vector<8x256xf32>
    %6 = arith.addf %3, %5 : vector<8x256xf32>
    %c0_5 = arith.constant 0 : index
    %c0_6 = arith.constant 0 : index
    %7 = vector.load %arg4[%c0_5, %c0_6] : memref<1x128xf32, #tpu.memory_space<vmem>>, vector<1x128xf32>
    %c0_7 = arith.constant 0 : index
    %c0_8 = arith.constant 0 : index
    %8 = vector.load %arg5[%c0_7, %c0_8] : memref<1x128xf32, #tpu.memory_space<vmem>>, vector<1x128xf32>
    %9 = vector.extract_strided_slice %6 {offsets = [0, 0], sizes = [8, 128], strides = [1, 1]} : vector<8x256xf32> to vector<8x128xf32>
    %10 = vector.extract_strided_slice %6 {offsets = [0, 128], sizes = [8, 1], strides = [1, 1]} : vector<8x256xf32> to vector<8x1xf32>
    %cst_9 = arith.constant 7.812500e-03 : f32
    %11 = vector.broadcast %cst_9 : f32 to vector<8x1xf32>
    %12 = arith.mulf %10, %11 : vector<8x1xf32>
    %13 = vector.broadcast %12 : vector<8x1xf32> to vector<8x128xf32>
    %14 = arith.subf %9, %13 : vector<8x128xf32>
    %15 = arith.mulf %14, %14 : vector<8x128xf32>
    %cst_10 = arith.constant dense<0.000000e+00> : vector<8xf32>
    %16 = vector.multi_reduction <add>, %15, %cst_10 [1] : vector<8x128xf32> to vector<8xf32>
    %17 = vector.shape_cast %16 : vector<8xf32> to vector<8x1xf32>
    %cst_11 = arith.constant 1.280000e+02 : f32
    %18 = vector.broadcast %cst_11 : f32 to vector<8x1xf32>
    %19 = arith.divf %17, %18 : vector<8x1xf32>
    %cst_12 = arith.constant 9.99999974E-6 : f32
    %20 = vector.broadcast %cst_12 : f32 to vector<8x1xf32>
    %21 = arith.addf %19, %20 : vector<8x1xf32>
    %22 = math.rsqrt %21 : vector<8x1xf32>
    %23 = vector.broadcast %22 : vector<8x1xf32> to vector<8x128xf32>
    %24 = arith.mulf %14, %23 : vector<8x128xf32>
    %25 = vector.broadcast %7 : vector<1x128xf32> to vector<8x128xf32>
    %26 = arith.mulf %24, %25 : vector<8x128xf32>
    %27 = vector.broadcast %8 : vector<1x128xf32> to vector<8x128xf32>
    %28 = arith.addf %26, %27 : vector<8x128xf32>
    %cst_13 = arith.constant 0.000000e+00 : f32
    %29 = vector.broadcast %cst_13 : f32 to vector<8x128xf32>
    %30 = arith.cmpf oge, %28, %29 : vector<8x128xf32>
    %cst_14 = arith.constant 1.000000e-01 : f32
    %31 = vector.broadcast %cst_14 : f32 to vector<8x128xf32>
    %32 = arith.mulf %31, %28 : vector<8x128xf32>
    %33 = arith.select %30, %28, %32 : vector<8x128xi1>, vector<8x128xf32>
    %34 = arith.truncf %33 : vector<8x128xf32> to vector<8x128xbf16>
    %c0_15 = arith.constant 0 : index
    %c0_16 = arith.constant 0 : index
    %35 = vector.load %arg6[%c0_15, %c0_16] : memref<128x256xbf16, #tpu.memory_space<vmem>>, vector<128x256xbf16>
    %cst_17 = arith.constant dense<0.000000e+00> : vector<8x256xf32>
    %36 = tpu.matmul %34, %35, %cst_17 {dimension_numbers = #tpu.dot_dimension_numbers<[1], [0], [0], [1], [0, 0, 1, 1], [], []>} : vector<8x128xbf16>, vector<128x256xbf16>, vector<8x256xf32> -> vector<8x256xf32>
    %c0_18 = arith.constant 0 : index
    %c0_19 = arith.constant 0 : index
    %37 = vector.load %arg7[%c0_18, %c0_19] : memref<1x256xf32, #tpu.memory_space<vmem>>, vector<1x256xf32>
    %38 = vector.broadcast %37 : vector<1x256xf32> to vector<8x256xf32>
    %39 = arith.addf %36, %38 : vector<8x256xf32>
    %c0_20 = arith.constant 0 : index
    %c0_21 = arith.constant 0 : index
    %40 = vector.load %arg8[%c0_20, %c0_21] : memref<1x128xf32, #tpu.memory_space<vmem>>, vector<1x128xf32>
    %c0_22 = arith.constant 0 : index
    %c0_23 = arith.constant 0 : index
    %41 = vector.load %arg9[%c0_22, %c0_23] : memref<1x128xf32, #tpu.memory_space<vmem>>, vector<1x128xf32>
    %42 = vector.extract_strided_slice %39 {offsets = [0, 0], sizes = [8, 128], strides = [1, 1]} : vector<8x256xf32> to vector<8x128xf32>
    %43 = vector.extract_strided_slice %39 {offsets = [0, 128], sizes = [8, 1], strides = [1, 1]} : vector<8x256xf32> to vector<8x1xf32>
    %cst_24 = arith.constant 7.812500e-03 : f32
    %44 = vector.broadcast %cst_24 : f32 to vector<8x1xf32>
    %45 = arith.mulf %43, %44 : vector<8x1xf32>
    %46 = vector.broadcast %45 : vector<8x1xf32> to vector<8x128xf32>
    %47 = arith.subf %42, %46 : vector<8x128xf32>
    %48 = arith.mulf %47, %47 : vector<8x128xf32>
    %cst_25 = arith.constant dense<0.000000e+00> : vector<8xf32>
    %49 = vector.multi_reduction <add>, %48, %cst_25 [1] : vector<8x128xf32> to vector<8xf32>
    %50 = vector.shape_cast %49 : vector<8xf32> to vector<8x1xf32>
    %cst_26 = arith.constant 1.280000e+02 : f32
    %51 = vector.broadcast %cst_26 : f32 to vector<8x1xf32>
    %52 = arith.divf %50, %51 : vector<8x1xf32>
    %cst_27 = arith.constant 9.99999974E-6 : f32
    %53 = vector.broadcast %cst_27 : f32 to vector<8x1xf32>
    %54 = arith.addf %52, %53 : vector<8x1xf32>
    %55 = math.rsqrt %54 : vector<8x1xf32>
    %56 = vector.broadcast %55 : vector<8x1xf32> to vector<8x128xf32>
    %57 = arith.mulf %47, %56 : vector<8x128xf32>
    %58 = vector.broadcast %40 : vector<1x128xf32> to vector<8x128xf32>
    %59 = arith.mulf %57, %58 : vector<8x128xf32>
    %60 = vector.broadcast %41 : vector<1x128xf32> to vector<8x128xf32>
    %61 = arith.addf %59, %60 : vector<8x128xf32>
    %cst_28 = arith.constant 0.000000e+00 : f32
    %62 = vector.broadcast %cst_28 : f32 to vector<8x128xf32>
    %63 = arith.cmpf oge, %61, %62 : vector<8x128xf32>
    %cst_29 = arith.constant 1.000000e-01 : f32
    %64 = vector.broadcast %cst_29 : f32 to vector<8x128xf32>
    %65 = arith.mulf %64, %61 : vector<8x128xf32>
    %66 = arith.select %63, %61, %65 : vector<8x128xi1>, vector<8x128xf32>
    %67 = arith.addf %66, %33 : vector<8x128xf32>
    %68 = arith.truncf %67 : vector<8x128xf32> to vector<8x128xbf16>
    %c0_30 = arith.constant 0 : index
    %c0_31 = arith.constant 0 : index
    %69 = vector.load %arg10[%c0_30, %c0_31] : memref<128x256xbf16, #tpu.memory_space<vmem>>, vector<128x256xbf16>
    %cst_32 = arith.constant dense<0.000000e+00> : vector<8x256xf32>
    %70 = tpu.matmul %68, %69, %cst_32 {dimension_numbers = #tpu.dot_dimension_numbers<[1], [0], [0], [1], [0, 0, 1, 1], [], []>} : vector<8x128xbf16>, vector<128x256xbf16>, vector<8x256xf32> -> vector<8x256xf32>
    %c0_33 = arith.constant 0 : index
    %c0_34 = arith.constant 0 : index
    %71 = vector.load %arg11[%c0_33, %c0_34] : memref<1x256xf32, #tpu.memory_space<vmem>>, vector<1x256xf32>
    %72 = vector.broadcast %71 : vector<1x256xf32> to vector<8x256xf32>
    %73 = arith.addf %70, %72 : vector<8x256xf32>
    %c0_35 = arith.constant 0 : index
    %c0_36 = arith.constant 0 : index
    %74 = vector.load %arg12[%c0_35, %c0_36] : memref<1x128xf32, #tpu.memory_space<vmem>>, vector<1x128xf32>
    %c0_37 = arith.constant 0 : index
    %c0_38 = arith.constant 0 : index
    %75 = vector.load %arg13[%c0_37, %c0_38] : memref<1x128xf32, #tpu.memory_space<vmem>>, vector<1x128xf32>
    %76 = vector.extract_strided_slice %73 {offsets = [0, 0], sizes = [8, 128], strides = [1, 1]} : vector<8x256xf32> to vector<8x128xf32>
    %77 = vector.extract_strided_slice %73 {offsets = [0, 128], sizes = [8, 1], strides = [1, 1]} : vector<8x256xf32> to vector<8x1xf32>
    %cst_39 = arith.constant 7.812500e-03 : f32
    %78 = vector.broadcast %cst_39 : f32 to vector<8x1xf32>
    %79 = arith.mulf %77, %78 : vector<8x1xf32>
    %80 = vector.broadcast %79 : vector<8x1xf32> to vector<8x128xf32>
    %81 = arith.subf %76, %80 : vector<8x128xf32>
    %82 = arith.mulf %81, %81 : vector<8x128xf32>
    %cst_40 = arith.constant dense<0.000000e+00> : vector<8xf32>
    %83 = vector.multi_reduction <add>, %82, %cst_40 [1] : vector<8x128xf32> to vector<8xf32>
    %84 = vector.shape_cast %83 : vector<8xf32> to vector<8x1xf32>
    %cst_41 = arith.constant 1.280000e+02 : f32
    %85 = vector.broadcast %cst_41 : f32 to vector<8x1xf32>
    %86 = arith.divf %84, %85 : vector<8x1xf32>
    %cst_42 = arith.constant 9.99999974E-6 : f32
    %87 = vector.broadcast %cst_42 : f32 to vector<8x1xf32>
    %88 = arith.addf %86, %87 : vector<8x1xf32>
    %89 = math.rsqrt %88 : vector<8x1xf32>
    %90 = vector.broadcast %89 : vector<8x1xf32> to vector<8x128xf32>
    %91 = arith.mulf %81, %90 : vector<8x128xf32>
    %92 = vector.broadcast %74 : vector<1x128xf32> to vector<8x128xf32>
    %93 = arith.mulf %91, %92 : vector<8x128xf32>
    %94 = vector.broadcast %75 : vector<1x128xf32> to vector<8x128xf32>
    %95 = arith.addf %93, %94 : vector<8x128xf32>
    %cst_43 = arith.constant 0.000000e+00 : f32
    %96 = vector.broadcast %cst_43 : f32 to vector<8x128xf32>
    %97 = arith.cmpf oge, %95, %96 : vector<8x128xf32>
    %cst_44 = arith.constant 1.000000e-01 : f32
    %98 = vector.broadcast %cst_44 : f32 to vector<8x128xf32>
    %99 = arith.mulf %98, %95 : vector<8x128xf32>
    %100 = arith.select %97, %95, %99 : vector<8x128xi1>, vector<8x128xf32>
    %101 = arith.addf %100, %67 : vector<8x128xf32>
    %102 = arith.truncf %101 : vector<8x128xf32> to vector<8x128xbf16>
    %c0_45 = arith.constant 0 : index
    %c0_46 = arith.constant 0 : index
    %103 = vector.load %arg14[%c0_45, %c0_46] : memref<128x128xbf16, #tpu.memory_space<vmem>>, vector<128x128xbf16>
    %cst_47 = arith.constant dense<0.000000e+00> : vector<8x128xf32>
    %104 = tpu.matmul %102, %103, %cst_47 {dimension_numbers = #tpu.dot_dimension_numbers<[1], [0], [0], [1], [0, 0, 1, 1], [], []>} : vector<8x128xbf16>, vector<128x128xbf16>, vector<8x128xf32> -> vector<8x128xf32>
    %c0_48 = arith.constant 0 : index
    %c0_49 = arith.constant 0 : index
    %105 = vector.load %arg15[%c0_48, %c0_49] : memref<1x128xf32, #tpu.memory_space<vmem>>, vector<1x128xf32>
    %106 = vector.broadcast %105 : vector<1x128xf32> to vector<8x128xf32>
    %107 = arith.addf %104, %106 : vector<8x128xf32>
    %c0_50 = arith.constant 0 : index
    %c0_51 = arith.constant 0 : index
    %108 = vector.load %arg16[%c0_50, %c0_51] : memref<1x64xf32, #tpu.memory_space<vmem>>, vector<1x64xf32>
    %c0_52 = arith.constant 0 : index
    %c0_53 = arith.constant 0 : index
    %109 = vector.load %arg17[%c0_52, %c0_53] : memref<1x64xf32, #tpu.memory_space<vmem>>, vector<1x64xf32>
    %110 = vector.extract_strided_slice %107 {offsets = [0, 0], sizes = [8, 64], strides = [1, 1]} : vector<8x128xf32> to vector<8x64xf32>
    %111 = vector.extract_strided_slice %107 {offsets = [0, 64], sizes = [8, 1], strides = [1, 1]} : vector<8x128xf32> to vector<8x1xf32>
    %cst_54 = arith.constant 1.562500e-02 : f32
    %112 = vector.broadcast %cst_54 : f32 to vector<8x1xf32>
    %113 = arith.mulf %111, %112 : vector<8x1xf32>
    %114 = vector.broadcast %113 : vector<8x1xf32> to vector<8x64xf32>
    %115 = arith.subf %110, %114 : vector<8x64xf32>
    %116 = arith.mulf %115, %115 : vector<8x64xf32>
    %cst_55 = arith.constant dense<0.000000e+00> : vector<8xf32>
    %117 = vector.multi_reduction <add>, %116, %cst_55 [1] : vector<8x64xf32> to vector<8xf32>
    %118 = vector.shape_cast %117 : vector<8xf32> to vector<8x1xf32>
    %cst_56 = arith.constant 6.400000e+01 : f32
    %119 = vector.broadcast %cst_56 : f32 to vector<8x1xf32>
    %120 = arith.divf %118, %119 : vector<8x1xf32>
    %cst_57 = arith.constant 9.99999974E-6 : f32
    %121 = vector.broadcast %cst_57 : f32 to vector<8x1xf32>
    %122 = arith.addf %120, %121 : vector<8x1xf32>
    %123 = math.rsqrt %122 : vector<8x1xf32>
    %124 = vector.broadcast %123 : vector<8x1xf32> to vector<8x64xf32>
    %125 = arith.mulf %115, %124 : vector<8x64xf32>
    %126 = vector.broadcast %108 : vector<1x64xf32> to vector<8x64xf32>
    %127 = arith.mulf %125, %126 : vector<8x64xf32>
    %128 = vector.broadcast %109 : vector<1x64xf32> to vector<8x64xf32>
    %129 = arith.addf %127, %128 : vector<8x64xf32>
    %cst_58 = arith.constant 0.000000e+00 : f32
    %130 = vector.broadcast %cst_58 : f32 to vector<8x64xf32>
    %131 = arith.cmpf oge, %129, %130 : vector<8x64xf32>
    %cst_59 = arith.constant 1.000000e-01 : f32
    %132 = vector.broadcast %cst_59 : f32 to vector<8x64xf32>
    %133 = arith.mulf %132, %129 : vector<8x64xf32>
    %134 = arith.select %131, %129, %133 : vector<8x64xi1>, vector<8x64xf32>
    %135 = arith.truncf %134 : vector<8x64xf32> to vector<8x64xbf16>
    %c0_60 = arith.constant 0 : index
    %c0_61 = arith.constant 0 : index
    %136 = vector.load %arg18[%c0_60, %c0_61] : memref<64x128xbf16, #tpu.memory_space<vmem>>, vector<64x128xbf16>
    %cst_62 = arith.constant dense<0.000000e+00> : vector<8x128xf32>
    %137 = tpu.matmul %135, %136, %cst_62 {dimension_numbers = #tpu.dot_dimension_numbers<[1], [0], [0], [1], [0, 0, 1, 1], [], []>} : vector<8x64xbf16>, vector<64x128xbf16>, vector<8x128xf32> -> vector<8x128xf32>
    %c0_63 = arith.constant 0 : index
    %c0_64 = arith.constant 0 : index
    %138 = vector.load %arg19[%c0_63, %c0_64] : memref<1x128xf32, #tpu.memory_space<vmem>>, vector<1x128xf32>
    %139 = vector.broadcast %138 : vector<1x128xf32> to vector<8x128xf32>
    %140 = arith.addf %137, %139 : vector<8x128xf32>
    %c0_65 = arith.constant 0 : index
    %c0_66 = arith.constant 0 : index
    %141 = vector.load %arg20[%c0_65, %c0_66] : memref<8x128xf32, #tpu.memory_space<vmem>>, vector<8x128xf32>
    tpu.vector_store %arg20[%c0_65, %c0_66], %140 {strides = array<i32>} : memref<8x128xf32, #tpu.memory_space<vmem>>, vector<8x128xf32>,
    return
  }
  func.func @transform_0(%arg0: i32) -> (i32, i32) {
    %c0_i32 = arith.constant 0 : i32
    %c0_i32_0 = arith.constant 0 : i32
    return %arg0, %c0_i32 : i32, i32
  }
  func.func @transform_1(%arg0: i32) -> (i32, i32) {
    %c0_i32 = arith.constant 0 : i32
    %c0_i32_0 = arith.constant 0 : i32
    %c0_i32_1 = arith.constant 0 : i32
    return %c0_i32, %c0_i32_0 : i32, i32
  }
  func.func @transform_2(%arg0: i32) -> (i32, i32) {
    %c0_i32 = arith.constant 0 : i32
    %c0_i32_0 = arith.constant 0 : i32
    %c0_i32_1 = arith.constant 0 : i32
    return %c0_i32, %c0_i32_0 : i32, i32
  }
  func.func @transform_3(%arg0: i32) -> (i32, i32) {
    %c0_i32 = arith.constant 0 : i32
    %c0_i32_0 = arith.constant 0 : i32
    %c0_i32_1 = arith.constant 0 : i32
    return %c0_i32, %c0_i32_0 : i32, i32
  }
  func.func @transform_4(%arg0: i32) -> (i32, i32) {
    %c0_i32 = arith.constant 0 : i32
    %c0_i32_0 = arith.constant 0 : i32
    %c0_i32_1 = arith.constant 0 : i32
    return %c0_i32, %c0_i32_0 : i32, i32
  }
  func.func @transform_5(%arg0: i32) -> (i32, i32) {
    %c0_i32 = arith.constant 0 : i32
    %c0_i32_0 = arith.constant 0 : i32
    %c0_i32_1 = arith.constant 0 : i32
    return %c0_i32, %c0_i32_0 : i32, i32
  }
  func.func @transform_6(%arg0: i32) -> (i32, i32) {
    %c0_i32 = arith.constant 0 : i32
    %c0_i32_0 = arith.constant 0 : i32
    %c0_i32_1 = arith.constant 0 : i32
    return %c0_i32, %c0_i32_0 : i32, i32
  }
  func.func @transform_7(%arg0: i32) -> (i32, i32) {
    %c0_i32 = arith.constant 0 : i32
    %c0_i32_0 = arith.constant 0 : i32
    %c0_i32_1 = arith.constant 0 : i32
    return %c0_i32, %c0_i32_0 : i32, i32
  }
  func.func @transform_8(%arg0: i32) -> (i32, i32) {
    %c0_i32 = arith.constant 0 : i32
    %c0_i32_0 = arith.constant 0 : i32
    %c0_i32_1 = arith.constant 0 : i32
    return %c0_i32, %c0_i32_0 : i32, i32
  }
  func.func @transform_9(%arg0: i32) -> (i32, i32) {
    %c0_i32 = arith.constant 0 : i32
    %c0_i32_0 = arith.constant 0 : i32
    %c0_i32_1 = arith.constant 0 : i32
    return %c0_i32, %c0_i32_0 : i32, i32
  }
  func.func @transform_10(%arg0: i32) -> (i32, i32) {
    %c0_i32 = arith.constant 0 : i32
    %c0_i32_0 = arith.constant 0 : i32
    %c0_i32_1 = arith.constant 0 : i32
    return %c0_i32, %c0_i32_0 : i32, i32
  }
  func.func @transform_11(%arg0: i32) -> (i32, i32) {
    %c0_i32 = arith.constant 0 : i32
    %c0_i32_0 = arith.constant 0 : i32
    %c0_i32_1 = arith.constant 0 : i32
    return %c0_i32, %c0_i32_0 : i32, i32
  }
  func.func @transform_12(%arg0: i32) -> (i32, i32) {
    %c0_i32 = arith.constant 0 : i32
    %c0_i32_0 = arith.constant 0 : i32
    %c0_i32_1 = arith.constant 0 : i32
    return %c0_i32, %c0_i32_0 : i32, i32
  }
  func.func @transform_13(%arg0: i32) -> (i32, i32) {
    %c0_i32 = arith.constant 0 : i32
    %c0_i32_0 = arith.constant 0 : i32
    %c0_i32_1 = arith.constant 0 : i32
    return %c0_i32, %c0_i32_0 : i32, i32
  }
  func.func @transform_14(%arg0: i32) -> (i32, i32) {
    %c0_i32 = arith.constant 0 : i32
    %c0_i32_0 = arith.constant 0 : i32
    %c0_i32_1 = arith.constant 0 : i32
    return %c0_i32, %c0_i32_0 : i32, i32
  }
  func.func @transform_15(%arg0: i32) -> (i32, i32) {
    %c0_i32 = arith.constant 0 : i32
    %c0_i32_0 = arith.constant 0 : i32
    %c0_i32_1 = arith.constant 0 : i32
    return %c0_i32, %c0_i32_0 : i32, i32
  }
  func.func @transform_16(%arg0: i32) -> (i32, i32) {
    %c0_i32 = arith.constant 0 : i32
    %c0_i32_0 = arith.constant 0 : i32
    %c0_i32_1 = arith.constant 0 : i32
    return %c0_i32, %c0_i32_0 : i32, i32
  }
  func.func @transform_17(%arg0: i32) -> (i32, i32) {
    %c0_i32 = arith.constant 0 : i32
    %c0_i32_0 = arith.constant 0 : i32
    %c0_i32_1 = arith.constant 0 : i32
    return %c0_i32, %c0_i32_0 : i32, i32
  }
  func.func @transform_18(%arg0: i32) -> (i32, i32) {
    %c0_i32 = arith.constant 0 : i32
    %c0_i32_0 = arith.constant 0 : i32
    %c0_i32_1 = arith.constant 0 : i32
    return %c0_i32, %c0_i32_0 : i32, i32
  }
  func.func @transform_19(%arg0: i32) -> (i32, i32) {
    %c0_i32 = arith.constant 0 : i32
    %c0_i32_0 = arith.constant 0 : i32
    return %arg0, %c0_i32 : i32, i32
  }
}

</mosaic_0001>

<bundles_post_ra>
// kernel: tpu_custom_call.1
= control target key start
LH: loop header
LB: loop body
LE: loop exit
PB: predicated region body
PF: predicated region fallthrough
CT: control target
= control target key end

     0   :  { %s1479_s0 = inlined_call_operand.hbm [shape: f32[8,32], index: 0, kind: input, shape index: {}]   ;;  %s1480_s1 = inlined_call_operand.hbm [shape: bf16[32,256], index: 1, kind: input, shape index: {}]   ;;  %s1481_s2 = inlined_call_operand.vmem [shape: f32[1,256], index: 2, kind: input, shape index: {}]   ;;  %s1482_s3 = inlined_call_operand.vmem [shape: f32[1,128], index: 3, kind: input, shape index: {}]   ;;  %s1483_s4 = inlined_call_operand.vmem [shape: f32[1,128], index: 4, kind: input, shape index: {}]   ;;  %s1484_s5 = inlined_call_operand.hbm [shape: bf16[128,256], index: 5, kind: input, shape index: {}]   ;;  %s1485_s6 = inlined_call_operand.vmem [shape: f32[1,256], index: 6, kind: input, shape index: {}]   ;;  %s1486_s7 = inlined_call_operand.vmem [shape: f32[1,128], index: 7, kind: input, shape index: {}]   ;;  %s1487_s8 = inlined_call_operand.vmem [shape: f32[1,128], index: 8, kind: input, shape index: {}]   ;;  %s1488_s9 = inlined_call_operand.hbm [shape: bf16[128,256], index: 9, kind: input, shape index: {}]   ;;  %s1489_s10 = inlined_call_operand.vmem [shape: f32[1,256], index: 10, kind: input, shape index: {}]   ;;  %s1490_s11 = inlined_call_operand.vmem [shape: f32[1,128], index: 11, kind: input, shape index: {}]   ;;  %s1491_s12 = inlined_call_operand.vmem [shape: f32[1,128], index: 12, kind: input, shape index: {}]   ;;  %s1492_s13 = inlined_call_operand.hbm [shape: bf16[128,128], index: 13, kind: input, shape index: {}]   ;;  %s1493_s14 = inlined_call_operand.vmem [shape: f32[1,128], index: 14, kind: input, shape index: {}]   ;;  %s1494_s15 = inlined_call_operand.vmem [shape: f32[1,64], index: 15, kind: input, shape index: {}]   ;;  %s1495_s16 = inlined_call_operand.vmem [shape: f32[1,64], index: 16, kind: input, shape index: {}]   ;;  %s1496_s17 = inlined_call_operand.vmem [shape: bf16[64,128], index: 17, kind: input, shape index: {}]   ;;  %s1497_s18 = inlined_call_operand.vmem [shape: f32[1,128], index: 18, kind: input, shape index: {}]   ;;  %s1498_s19 = inlined_call_operand.hbm [shape: f32[8,128], index: 19, kind: output, shape index: {}]  }
   0x1   :  { %1502 = sst [smem:[#allocation16_spill]] %s1479_s0 }
   0x2   :  { %1503 = sst [smem:[#allocation17_spill]] %s1480_s1 }
   0x3   :  { %1504 = sst [smem:[#allocation18_spill]] %s1481_s2 }
   0x4   :  { %1505 = sst [smem:[#allocation19_spill]] %s1482_s3 }
   0x5   :  { %1506 = sst [smem:[#allocation20_spill]] %s1497_s18 }
   0x6   :  { %1507 = sst [smem:[#allocation21_spill]] %s1498_s19 }
   0x7   :  { %24 = vsyncpa [#allocation3], 0 }
   0x8   :  { %25 = vsyncpa [#allocation6], 0 }
   0x9   :  { %26 = vsyncpa [#allocation9], 0 }
   0xa   :  { %27 = vsyncpa [#allocation4], 0  ;;  %s1202_s0 = smov [#allocation5]   ;;  %s1508_s1 = sld [smem:[#allocation17_spill]] }
   0xb   :  { %s43_s30 = sshll.u32 %s1202_s0, 4  ;;  %s44_s30 = int_to_ptr.vmem [resolvable:$true] %s43_s30 }
  0x10   :  { %s1062_s22 = scalar_lea.hbm %s1508_s1, 512 }
  0x11   :  { %p1063_p0 = scmp.ne.s32.totalorder %s1508_s1, %s1062_s22  ;;  %p1066_p1 = scmp.lt.u32.totalorder %s1062_s22, %s1508_s1 }
  0x13   :  { %p1068_p2 = pnand %p1066_p1, %p1063_p0 }
  0x15   :  { %1071 = shalt.err (!%p1068_p2)
}
  0x16   :  { %s1072_s3 = scalar_lea.vmem %s44_s30, 512  ;;  %p1077_p4 = scmp.lt.s32.totalorder %s44_s30, %s44_s30 }
  0x17   :  { %p1073_p3 = scmp.ne.s32.totalorder %s44_s30, %s1072_s3  ;;  %p1078_p5 = scmp.lt.s32.totalorder %s1072_s3, %s1072_s3 }
  0x19   :  { %p1079_p6 = por %p1078_p5, %p1077_p4 }
  0x1b   :  { %p1080_p7 = pnand %p1079_p6, %p1073_p3 }
  0x1d   :  { %1083 = shalt.err (!%p1080_p7)
}
  0x1e   :  { %s1203_s26 = smov 128   ;;  %s1204_s27 = smov 8  }
  0x1f   :  { %49 = dma.hbm_to_vmem [thread:$0]  %s1508_s1, 512, %s44_s30, [#allocation6], %s1203_s26, %s1203_s26, %s1204_s27  }
  0x20   :  { %s1205_s0 = smov [#allocation8]   ;;  %s1206_s21 = smov [#allocation2]  }
  0x21   :  { %s79_s20 = sshll.u32 %s1205_s0, 4  ;;  %s34_s22 = sshll.u32 %s1206_s21, 4  ;;  %s80_s20 = int_to_ptr.vmem [resolvable:$true] %s79_s20  ;;  %s35_s22 = int_to_ptr.vmem [resolvable:$true] %s34_s22 }
  0x22   :  { %s1084_s24 = scalar_lea.hbm %s1488_s9, 2048 }
  0x23   :  { %p1085_p8 = scmp.ne.s32.totalorder %s1488_s9, %s1084_s24  ;;  %p1088_p9 = scmp.lt.u32.totalorder %s1084_s24, %s1488_s9 }
  0x25   :  { %p1090_p10 = pnand %p1088_p9, %p1085_p8 }
  0x27   :  { %1093 = shalt.err (!%p1090_p10)
}
  0x28   :  { %s1094_s30 = scalar_lea.vmem %s80_s20, 2048  ;;  %p1099_p12 = scmp.lt.s32.totalorder %s80_s20, %s80_s20 }
  0x29   :  { %p1095_p11 = scmp.ne.s32.totalorder %s80_s20, %s1094_s30  ;;  %p1100_p13 = scmp.lt.s32.totalorder %s1094_s30, %s1094_s30 }
  0x2b   :  { %p1101_p0 = por %p1100_p13, %p1099_p12 }
  0x2d   :  { %p1102_p1 = pnand %p1101_p0, %p1095_p11 }
  0x2f   :  { %1105 = shalt.err (!%p1102_p1)
}
  0x30   :  { %85 = dma.hbm_to_vmem [thread:$0]  %s1488_s9, 2048, %s80_s20, [#allocation9], %s1203_s26, %s1203_s26, %s1204_s27  }
  0x31   :  { %s1509_s19 = sld [smem:[#allocation16_spill]] }
  0x37   :  { %s1106_s0 = scalar_lea.hbm %s1509_s19, 128 }
  0x38   :  { %p1107_p2 = scmp.ne.s32.totalorder %s1509_s19, %s1106_s0  ;;  %p1110_p3 = scmp.lt.u32.totalorder %s1106_s0, %s1509_s19 }
  0x3a   :  { %p1112_p4 = pnand %p1110_p3, %p1107_p2 }
  0x3c   :  { %1115 = shalt.err (!%p1112_p4)
}
  0x3d   :  { %s1116_s25 = scalar_lea.vmem %s35_s22, 128  ;;  %p1121_p6 = scmp.lt.s32.totalorder %s35_s22, %s35_s22 }
  0x3e   :  { %p1117_p5 = scmp.ne.s32.totalorder %s35_s22, %s1116_s25  ;;  %p1122_p7 = scmp.lt.s32.totalorder %s1116_s25, %s1116_s25 }
  0x40   :  { %p1123_p8 = por %p1122_p7, %p1121_p6 }
  0x42   :  { %p1124_p9 = pnand %p1123_p8, %p1117_p5 }
  0x44   :  { %1127 = shalt.err (!%p1124_p9)
}
  0x45   :  { %37 = dma.hbm_to_vmem [thread:$0]  %s1509_s19, 128, %s35_s22, [#allocation3]  }
  0x46   :  { %s1207_s3 = smov [#allocation7]   ;;  %s1208_s1 = smov [#allocation10]  }
  0x47   :  { %s61_s30 = sshll.u32 %s1207_s3, 4  ;;  %s97_s28 = sshll.u32 %s1208_s1, 4  ;;  %s62_s30 = int_to_ptr.vmem [resolvable:$true] %s61_s30  ;;  %s98_s28 = int_to_ptr.vmem [resolvable:$true] %s97_s28 }
  0x48   :  { %s1128_s0 = scalar_lea.hbm %s1484_s5, 2048 }
  0x49   :  { %p1129_p10 = scmp.ne.s32.totalorder %s1484_s5, %s1128_s0  ;;  %p1132_p11 = scmp.lt.u32.totalorder %s1128_s0, %s1484_s5 }
  0x4b   :  { %p1134_p12 = pnand %p1132_p11, %p1129_p10 }
  0x4d   :  { %1137 = shalt.err (!%p1134_p12)
}
  0x4e   :  { %s1138_s22 = scalar_lea.vmem %s62_s30, 2048  ;;  %p1143_p0 = scmp.lt.s32.totalorder %s62_s30, %s62_s30 }
  0x4f   :  { %p1139_p13 = scmp.ne.s32.totalorder %s62_s30, %s1138_s22  ;;  %p1144_p1 = scmp.lt.s32.totalorder %s1138_s22, %s1138_s22 }
  0x51   :  { %p1145_p2 = por %p1144_p1, %p1143_p0 }
  0x53   :  { %p1146_p3 = pnand %p1145_p2, %p1139_p13 }
  0x55   :  { %1149 = shalt.err (!%p1146_p3)
}
  0x56   :  { %67 = dma.hbm_to_vmem [thread:$0]  %s1484_s5, 2048, %s62_s30, [#allocation6], %s1203_s26, %s1203_s26, %s1204_s27  }
  0x57   :  { %s1150_s3 = scalar_lea.hbm %s1492_s13, 1024 }
  0x58   :  { %p1151_p4 = scmp.ne.s32.totalorder %s1492_s13, %s1150_s3  ;;  %p1154_p5 = scmp.lt.u32.totalorder %s1150_s3, %s1492_s13 }
  0x5a   :  { %p1156_p6 = pnand %p1154_p5, %p1151_p4 }
  0x5c   :  { %1159 = shalt.err (!%p1156_p6)
}
  0x5d   :  { %s1160_s21 = scalar_lea.vmem %s98_s28, 1024  ;;  %p1165_p8 = scmp.lt.s32.totalorder %s98_s28, %s98_s28 }
  0x5e   :  { %p1161_p7 = scmp.ne.s32.totalorder %s98_s28, %s1160_s21  ;;  %p1166_p9 = scmp.lt.s32.totalorder %s1160_s21, %s1160_s21 }
  0x60   :  { %p1167_p10 = por %p1166_p9, %p1165_p8 }
  0x62   :  { %p1168_p11 = pnand %p1167_p10, %p1161_p7 }
  0x64   :  { %1171 = shalt.err (!%p1168_p11)
}
  0x65   :  { %s1209_s5 = smov 64   ;;  %s1210_s26 = smov 4  }
  0x66   :  { %103 = dma.hbm_to_vmem [thread:$0]  %s1492_s13, 1024, %s98_s28, [#allocation9], %s1209_s5, %s1209_s5, %s1210_s26  }
  0x67   :  { %1194 = dma.done.wait [#allocation3], 128  }
  0x68   :  { %1195 = vsyncadd [#allocation3], 4294967168 }
  0x69   :  { %1196 = dma.done.wait [#allocation6], 2560  }
  0x6a   :  { %1197 = vsyncadd [#allocation6], 4294964736 }
  0x6b   :  { %1198 = dma.done.wait [#allocation9], 3072  }
  0x6c   :  { %1199 = vsyncadd [#allocation9], 4294964224  ;;  %v1211_v0 = vmov 0   ;;  %v988_v1 = vld [vmem:[#allocation5 + $0x4] ss:$8 sps:$4 sm:$0xff]   ;;  %v130_v5 = vld [vmem:[#allocation2] sm:$0xff]  ;;  %v138_v7 = vlaneseq }
  0x6d   :  { %204 = vmatprep.mubr.bf16.mxu0 %v1211_v0  ;;  %984 = vset.pattern.permute.xlu0 %v1211_v0  ;;  %v990_v2 = vld [vmem:[#allocation5] ss:$8 sps:$4 sm:$0xff]   ;;  %v991_v3 = vld [vmem:[#allocation5 + $0x14] ss:$8 sps:$4 sm:$0xff]   ;;  %v993_v4 = vld [vmem:[#allocation5 + $0x10] ss:$8 sps:$4 sm:$0xff]   ;;  %v131_v6 = vpack.c.bf16 %v130_v5, %v130_v5 }
  0x6e   :  { %388 = vmatprep.mubr.bf16.mxu1 %v1211_v0  ;;  %985 = vset.pattern.permute.xlu1 %v1211_v0  ;;  %vm168_vm0 = vcmask 261120   ;;  %v139_v8 = vshrl.u32 %v138_v7, 7  ;;  %s1510_s2 = sld [smem:[#allocation18_spill]]  ;;  %v994_v18 = vld [vmem:[#allocation7 + $0x4] ss:$8 sps:$4 sm:$0xff]   ;;  %s1511_s22 = sld [smem:[#allocation19_spill]] }
  0x6f   :  { %172 = vmatprep.subr.bf16.mxu0 %v988_v1  ;;  %v996_v19 = vld [vmem:[#allocation7] ss:$8 sps:$4 sm:$0xff]   ;;  %v997_v20 = vld [vmem:[#allocation7 + $0x14] ss:$8 sps:$4 sm:$0xff]   ;;  %356 = vmatprep.subr.bf16.mxu1 %v994_v18  ;;  %v999_v21 = vld [vmem:[#allocation7 + $0x10] ss:$8 sps:$4 sm:$0xff]  }
  0x70   :  { %173 = vmatpush1.bf16.msra.mxu0 %v990_v2  ;;  %v1385_v9 = vsub.s32 1, %v139_v8  ;;  %357 = vmatpush1.bf16.msra.mxu1 %v996_v19  ;;  %v1391_v22 = vsub.s32 0, %v139_v8  ;;  %v1000_v28 = vld [vmem:[#allocation7 + $0x24] ss:$8 sps:$4 sm:$0xff]   ;;  %v1002_v29 = vld [vmem:[#allocation7 + $0x20] ss:$8 sps:$4 sm:$0xff]  }
  0x71   :  { %174 = vmatprep.subr.bf16.mxu0 %v991_v3  ;;  %358 = vmatprep.subr.bf16.mxu1 %v997_v20  ;;  %v1003_v30 = vld [vmem:[#allocation7 + $0x34] ss:$8 sps:$4 sm:$0xff]   ;;  %v1005_v31 = vld [vmem:[#allocation7 + $0x30] ss:$8 sps:$4 sm:$0xff]   ;;  %v1006_v32 = vld [vmem:[#allocation7 + $0x44] ss:$8 sps:$4 sm:$0xff]  }
  0x72   :  { %v1008_v33 = vld [vmem:[#allocation7 + $0x40] ss:$8 sps:$4 sm:$0xff]   ;;  %v1009_v34 = vld [vmem:[#allocation7 + $0x54] ss:$8 sps:$4 sm:$0xff]   ;;  %v1011_v35 = vld [vmem:[#allocation7 + $0x50] ss:$8 sps:$4 sm:$0xff]  }
  0x73   :  { %v1012_v36 = vld [vmem:[#allocation7 + $0x64] ss:$8 sps:$4 sm:$0xff]   ;;  %v1014_v37 = vld [vmem:[#allocation7 + $0x60] ss:$8 sps:$4 sm:$0xff]   ;;  %v1015_v38 = vld [vmem:[#allocation7 + $0x74] ss:$8 sps:$4 sm:$0xff]  }
  0x74   :  { %175 = vmatpush1.bf16.msra.mxu0 %v993_v4  ;;  %v136_v10 = vld [vmem:[%s1510_s2] sm:$0x3]  ;;  %359 = vmatpush1.bf16.msra.mxu1 %v999_v21  ;;  %v1018_v60 = vld [vmem:[#allocation8] ss:$8 sps:$4 sm:$0xff]   ;;  %v1020_v61 = vld [vmem:[#allocation8 + $0x4] ss:$8 sps:$4 sm:$0xff]  }
  0x75   :  { %v145_v11 = vrot.slane %v136_v10, %v1385_v9  ;;  %v141_v23 = vrot.slane %v136_v10, %v1391_v22  ;;  %360 = vmatprep.subr.bf16.mxu1 %v1000_v28  ;;  %v1017_v39 = vld [vmem:[#allocation7 + $0x70] ss:$8 sps:$4 sm:$0xff]   ;;  %540 = vmatprep.subr.bf16.mxu0 %v1020_v61  ;;  %v1023_v3 = vld [vmem:[#allocation8 + $0x14] ss:$8 sps:$4 sm:$0xff]   ;;  %v1026_v5 = vld [vmem:[#allocation8 + $0x24] ss:$8 sps:$4 sm:$0xff]  }
  0x76   :  { %v869_v44 = vld [vmem:[%s1511_s22] ss:$0 sm:$0xff]  ;;  %v1029_v7 = vld [vmem:[#allocation8 + $0x34] ss:$8 sps:$4 sm:$0xff]   ;;  %v1032_v10 = vld [vmem:[#allocation8 + $0x44] ss:$8 sps:$4 sm:$0xff]  }
  0x77   :  { %868 = vmatmul.mubr.msk.bf16.vlgmr.msra.gmra.mrb[0].mxu0 %vm168_vm0, %v131_v6  ;;  %v870_v46 = vld [vmem:[%s1483_s4] ss:$0 sm:$0xff]  ;;  %v1024_v6 = vld [vmem:[#allocation8 + $0x20] ss:$8 sps:$4 sm:$0xff]   ;;  %vm1213_vm3 = vmmov 0   ;;  %vm737_vm5 = vcmask 523264  }
  0x78   :  { %572 = vmatprep.mubr.bf16.mxu0 %v1211_v0  ;;  %361 = vmatpush1.bf16.msra.mxu1 %v1002_v29  ;;  %v264_v52 = vld [vmem:[%s1485_s6] sm:$0x3]  ;;  %s1512_s25 = sld [smem:[#allocation20_spill]]  ;;  %s1215_s9 = smov [#allocation11]  }
  0x79   :  { %362 = vmatprep.subr.bf16.mxu1 %v1003_v30  ;;  %v273_v53 = vrot.slane %v264_v52, %v1385_v9  ;;  %541 = vmatpush1.bf16.msra.mxu0 %v1018_v60  ;;  %v269_v62 = vrot.slane %v264_v52, %v1391_v22  ;;  %v1021_v4 = vld [vmem:[#allocation8 + $0x10] ss:$8 sps:$4 sm:$0xff]   ;;  %s853_s20 = sshll.u32 %s1215_s9, 4  ;;  %s854_s20 = int_to_ptr.vmem [resolvable:$true] %s853_s20 }
  0x7a   :  { %542 = vmatprep.subr.bf16.mxu0 %v1023_v3  ;;  %v1027_v8 = vld [vmem:[#allocation8 + $0x30] ss:$8 sps:$4 sm:$0xff]   ;;  %p1177_p13 = scmp.lt.s32.totalorder %s854_s20, %s854_s20 }
  0x7c   :  { %363 = vmatpush1.bf16.msra.mxu1 %v1005_v31 }
  0x7d   :  { %364 = vmatprep.subr.bf16.mxu1 %v1006_v32  ;;  %543 = vmatpush1.bf16.msra.mxu0 %v1021_v4  ;;  %v448_v32 = vld [vmem:[%s1489_s10] sm:$0x3] }
  0x7e   :  { %544 = vmatprep.subr.bf16.mxu0 %v1026_v5 }
  0x80   :  { %365 = vmatpush1.bf16.msra.mxu1 %v1008_v33  ;;  %v457_v33 = vrot.slane %v448_v32, %v1385_v9 }
  0x81   :  { %366 = vmatprep.subr.bf16.mxu1 %v1009_v34  ;;  %545 = vmatpush1.bf16.msra.mxu0 %v1024_v6 }
  0x82   :  { %546 = vmatprep.subr.bf16.mxu0 %v1029_v7 }
  0x84   :  { %367 = vmatpush1.bf16.msra.mxu1 %v1011_v35 }
  0x85   :  { %368 = vmatprep.subr.bf16.mxu1 %v1012_v36  ;;  %547 = vmatpush1.bf16.msra.mxu0 %v1027_v8 }
  0x86   :  { %548 = vmatprep.subr.bf16.mxu0 %v1032_v10 }
  0x88   :  { %369 = vmatpush1.bf16.msra.mxu1 %v1014_v37 }
  0x89   :  { %370 = vmatprep.subr.bf16.mxu1 %v1015_v38 }
  0x8c   :  { %371 = vmatpush1.bf16.msra.mxu1 %v1017_v39 }
 0x14a   :  { %v206_v12 = vpop.f32.mrb[0].mxu0 }
 0x14b   :  { %v208_v13 = vpop.f32.mrb[1].mxu0  ;;  %v207_v24 = vadd.f32 %v206_v12, %v141_v23  ;;  %v1035_v12 = vld [vmem:[#allocation8 + $0x54] ss:$8 sps:$4 sm:$0xff]   ;;  %v887_v23 = vld [vmem:[%s1486_s7] ss:$0 sm:$0xff] }
 0x14c   :  { %v209_v14 = vadd.f32 %v208_v13, %v145_v11  ;;  %v210_v15 = vpop.f32.mrb[2].mxu0  ;;  %v1030_v11 = vld [vmem:[#allocation8 + $0x40] ss:$8 sps:$4 sm:$0xff]   ;;  %v1033_v13 = vld [vmem:[#allocation8 + $0x50] ss:$8 sps:$4 sm:$0xff]  }
 0x14d   :  { %v211_v16 = vpop.f32.mrb[3].mxu0  ;;  %549 = vmatpush1.bf16.msra.mxu0 %v1030_v11  ;;  %v1038_v15 = vld [vmem:[#allocation8 + $0x64] ss:$8 sps:$4 sm:$0xff]  }
 0x14e   :  { %v215_v17 = vmul.f32 0.0078125, %v209_v14  ;;  %550 = vmatprep.subr.bf16.mxu0 %v1035_v12  ;;  %v1036_v14 = vld [vmem:[#allocation8 + $0x60] ss:$8 sps:$4 sm:$0xff]   ;;  %v1041_v16 = vld [vmem:[#allocation8 + $0x74] ss:$8 sps:$4 sm:$0xff]  }
 0x150   :  { %218 = vperm.xlu0 %984, %v215_v17   ;;  %v1039_v17 = vld [vmem:[#allocation8 + $0x70] ss:$8 sps:$4 sm:$0xff]  }
 0x151   :  { %551 = vmatpush1.bf16.msra.mxu0 %v1033_v13 }
 0x152   :  { %552 = vmatprep.subr.bf16.mxu0 %v1038_v15  ;;  %v1051_v15 = vld [vmem:[%s1496_s17 + $0x8] sm:$0xff]  }
 0x155   :  { %553 = vmatpush1.bf16.msra.mxu0 %v1036_v14  ;;  %v1050_v14 = vld [vmem:[%s1496_s17] sm:$0xff]  }
 0x156   :  { %554 = vmatprep.subr.bf16.mxu0 %v1041_v16  ;;  %v1052_v16 = vld [vmem:[%s1496_s17 + $0x10] sm:$0xff]  }
 0x159   :  { %555 = vmatpush1.bf16.msra.mxu0 %v1039_v17  ;;  %v1053_v17 = vld [vmem:[%s1496_s17 + $0x18] sm:$0xff]  }
 0x1cf   :  { %v219_v25 = vpop.permute.xlu0 %218 }
 0x1d0   :  { %v221_v26 = vsub.f32 %v207_v24, %v219_v25  ;;  %v888_v25 = vld [vmem:[%s1487_s8] ss:$0 sm:$0xff] }
 0x1d2   :  { %v222_v27 = vmul.f32 %v221_v26, %v221_v26 }
 0x1d4   :  { %223 = vadd.xlane.f32.xlu0 %v222_v27 }
 0x261   :  { %v224_v40 = vpop.xlane.xlu0 %223 }
 0x262   :  { %v226_v41 = vmul.f32 0.0078125, %v224_v40  ;;  %v1042_v40 = vld [vmem:[#allocation10] sm:$0xff]  }
 0x264   :  { %v227_v42 = vadd.f32 1e-05, %v226_v41  ;;  %v1212_v41 = vmov 0.0  }
 0x265   :  { %938 = vmatprep.subr.bf16.mxu1 %v1212_v41  ;;  %958 = vmatprep.subr.bf16.mxu0 %v1212_v41 }
 0x266   :  { %1054 = vrsqrt.f32 %v227_v42  ;;  %v453_v42 = vrot.slane %v448_v32, %v1391_v22  ;;  %v1047_v22 = vld [vmem:[#allocation10 + $0x28] sm:$0xff]  }
 0x270   :  { %v1055_v43 = vpop.eup %1054 }
 0x271   :  { %v229_v45 = vmul.f32 %v1055_v43, %v221_v26 }
 0x273   :  { %v236_v47 = vmul.f32 %v869_v44, %v229_v45 }
 0x275   :  { %v243_v48 = vadd.f32 %v870_v46, %v236_v47  ;;  %v1043_v46 = vld [vmem:[#allocation10 + $0x8] sm:$0xff]   ;;  %v1044_v47 = vld [vmem:[#allocation10 + $0x10] sm:$0xff]  }
 0x277   :  { %vm244_vm1 = vcmp.ge.f32.partialorder %v243_v48, 0.0  ;;  %v245_v49 = vmul.f32 0.1, %v243_v48 }
 0x279   :  { %v1400_v50 = vsel %vm244_vm1, %v243_v48, %v245_v49  ;;  %v1045_v48 = vld [vmem:[#allocation10 + $0x18] sm:$0xff]   ;;  %v1046_v49 = vld [vmem:[#allocation10 + $0x20] sm:$0xff]  }
 0x27a   :  { %v247_v51 = vpack.c.bf16 %v1400_v50, %v1400_v50 }
 0x27c   :  { %389 = vmatmul.mubr.bf16.vlgmr.msra.gmra.mrb[0].mxu1 %v247_v51  ;;  %v1049_v51 = vld [vmem:[#allocation10 + $0x38] sm:$0xff]  }
 0x27d   :  { %939 = vmatpush3.bf16.msra.mxu1 %v1042_v40  ;;  %954 = vmatprep.mubr.msk.bf16.mxu1 %vm1213_vm3, %v1212_v41 }
 0x27e   :  { %940 = vmatprep.subr.bf16.mxu1 %v1212_v41 }
 0x281   :  { %941 = vmatpush3.bf16.msra.mxu1 %v1043_v46 }
 0x282   :  { %942 = vmatprep.subr.bf16.mxu1 %v1212_v41 }
 0x285   :  { %943 = vmatpush3.bf16.msra.mxu1 %v1044_v47 }
 0x286   :  { %944 = vmatprep.subr.bf16.mxu1 %v1212_v41 }
 0x289   :  { %945 = vmatpush3.bf16.msra.mxu1 %v1045_v48 }
 0x28a   :  { %946 = vmatprep.subr.bf16.mxu1 %v1212_v41 }
 0x28d   :  { %947 = vmatpush3.bf16.msra.mxu1 %v1046_v49 }
 0x28e   :  { %948 = vmatprep.subr.bf16.mxu1 %v1212_v41 }
 0x291   :  { %949 = vmatpush3.bf16.msra.mxu1 %v1047_v22 }
 0x292   :  { %950 = vmatprep.subr.bf16.mxu1 %v1212_v41 }
 0x34f   :  { %v390_v54 = vpop.f32.mrb[0].mxu1 }
 0x350   :  { %v392_v55 = vpop.f32.mrb[1].mxu1  ;;  %v391_v63 = vadd.f32 %v390_v54, %v269_v62 }
 0x351   :  { %v393_v56 = vadd.f32 %v392_v55, %v273_v53  ;;  %v394_v57 = vpop.f32.mrb[2].mxu1 }
 0x352   :  { %v395_v58 = vpop.f32.mrb[3].mxu1 }
 0x353   :  { %v399_v59 = vmul.f32 0.0078125, %v393_v56  ;;  %v905_v56 = vld [vmem:[%s1490_s11] ss:$0 sm:$0xff] }
 0x354   :  { %v906_v58 = vld [vmem:[%s1491_s12] ss:$0 sm:$0xff] }
 0x355   :  { %402 = vperm.xlu1 %985, %v399_v59  }
 0x3d4   :  { %v403_v0 = vpop.permute.xlu1 %402 }
 0x3d5   :  { %v405_v1 = vsub.f32 %v391_v63, %v403_v0 }
 0x3d7   :  { %v406_v2 = vmul.f32 %v405_v1, %v405_v1 }
 0x3d9   :  { %407 = vadd.xlane.f32.xlu1 %v406_v2  ;;  %v907_v2 = vld [vmem:[%s1493_s14] ss:$0 sm:$0xff] }
 0x466   :  { %v408_v18 = vpop.xlane.xlu1 %407 }
 0x467   :  { %v409_v19 = vmul.f32 0.0078125, %v408_v18 }
 0x469   :  { %v410_v20 = vadd.f32 1e-05, %v409_v19 }
 0x46b   :  { %1056 = vrsqrt.f32 %v410_v20 }
 0x475   :  { %v1057_v21 = vpop.eup %1056 }
 0x476   :  { %v412_v24 = vmul.f32 %v1057_v21, %v405_v1  ;;  %v1214_v1 = vmov 64  }
 0x477   :  { %986 = vset.pattern.permute.xlu1 %v1214_v1 }
 0x478   :  { %v419_v26 = vmul.f32 %v887_v23, %v412_v24  ;;  %v916_v23 = vld [vmem:[%s1494_s15] ss:$0 sm:$0xff]  ;;  %s1172_s15 = scalar_lea.vmem %s854_s20, 128 }
 0x479   :  { %p1173_p12 = scmp.ne.s32.totalorder %s854_s20, %s1172_s15  ;;  %p1178_p0 = scmp.lt.s32.totalorder %s1172_s15, %s1172_s15 }
 0x47a   :  { %v426_v27 = vadd.f32 %v888_v25, %v419_v26  ;;  %v917_v25 = vld [vmem:[%s1495_s16] ss:$0 sm:$0xff] }
 0x47b   :  { %p1179_p1 = por %p1178_p0, %p1177_p13 }
 0x47c   :  { %vm427_vm2 = vcmp.ge.f32.partialorder %v426_v27, 0.0  ;;  %v428_v28 = vmul.f32 0.1, %v426_v27 }
 0x47d   :  { %p1180_p2 = pnand %p1179_p1, %p1173_p12 }
 0x47e   :  { %v429_v29 = vsel %vm427_vm2, %v426_v27, %v428_v28 }
 0x47f   :  { %v430_v30 = vadd.f32 %v429_v29, %v1400_v50  ;;  %v1048_v50 = vld [vmem:[#allocation10 + $0x30] sm:$0xff]  }
 0x480   :  { %951 = vmatpush3.bf16.msra.mxu1 %v1048_v50 }
 0x481   :  { %v431_v31 = vpack.c.bf16 %v430_v30, %v430_v30  ;;  %952 = vmatprep.subr.bf16.mxu1 %v1212_v41 }
 0x483   :  { %573 = vmatmul.mubr.bf16.vlgmr.msra.gmra.mrb[4].mxu0 %v431_v31  ;;  %v918_v31 = vld [vmem:[%s1512_s25] ss:$0 sm:$0xff] }
 0x484   :  { %966 = vmatprep.mubr.msk.bf16.mxu0 %vm1213_vm3, %v1212_v41  ;;  %953 = vmatpush3.bf16.msra.mxu1 %v1049_v51 }
 0x485   :  { %959 = vmatpush3.bf16.msra.mxu0 %v1050_v14 }
 0x486   :  { %960 = vmatprep.subr.bf16.mxu0 %v1212_v41 }
 0x489   :  { %961 = vmatpush3.bf16.msra.mxu0 %v1051_v15 }
 0x48a   :  { %962 = vmatprep.subr.bf16.mxu0 %v1212_v41 }
 0x48d   :  { %963 = vmatpush3.bf16.msra.mxu0 %v1052_v16 }
 0x48e   :  { %964 = vmatprep.subr.bf16.mxu0 %v1212_v41 }
 0x491   :  { %965 = vmatpush3.bf16.msra.mxu0 %v1053_v17 }
 0x556   :  { %v574_v34 = vpop.f32.mrb[4].mxu0 }
 0x557   :  { %v576_v35 = vpop.f32.mrb[5].mxu0  ;;  %v575_v43 = vadd.f32 %v574_v34, %v453_v42 }
 0x558   :  { %v577_v36 = vadd.f32 %v576_v35, %v457_v33  ;;  %v578_v37 = vpop.f32.mrb[6].mxu0 }
 0x559   :  { %v579_v38 = vpop.f32.mrb[7].mxu0 }
 0x55a   :  { %v583_v39 = vmul.f32 0.0078125, %v577_v36 }
 0x55c   :  { %586 = vperm.xlu0 %984, %v583_v39  }
 0x560   :  { %987 = vset.pattern.permute.xlu0 %v1214_v1 }
 0x5db   :  { %v587_v9 = vpop.permute.xlu0 %586 }
 0x5dc   :  { %v589_v44 = vsub.f32 %v575_v43, %v587_v9 }
 0x5de   :  { %v590_v45 = vmul.f32 %v589_v44, %v589_v44 }
 0x5e0   :  { %591 = vadd.xlane.f32.xlu1 %v590_v45 }
 0x66d   :  { %v592_v52 = vpop.xlane.xlu1 %591 }
 0x66e   :  { %v593_v53 = vmul.f32 0.0078125, %v592_v52 }
 0x670   :  { %v594_v54 = vadd.f32 1e-05, %v593_v53 }
 0x672   :  { %1058 = vrsqrt.f32 %v594_v54 }
 0x67c   :  { %v1059_v55 = vpop.eup %1058 }
 0x67d   :  { %v596_v57 = vmul.f32 %v1059_v55, %v589_v44 }
 0x67f   :  { %v603_v59 = vmul.f32 %v905_v56, %v596_v57 }
 0x681   :  { %v610_v60 = vadd.f32 %v906_v58, %v603_v59 }
 0x683   :  { %vm611_vm4 = vcmp.ge.f32.partialorder %v610_v60, 0.0  ;;  %v612_v61 = vmul.f32 0.1, %v610_v60 }
 0x685   :  { %v613_v62 = vsel %vm611_vm4, %v610_v60, %v612_v61 }
 0x686   :  { %v614_v63 = vadd.f32 %v613_v62, %v430_v30 }
 0x688   :  { %v615_v0 = vpack.c.bf16 %v614_v63, %v614_v63 }
 0x68a   :  { %955 = vmatmul.mubr.bf16.vlgmr.msra.gmra.mrb[4].mxu1 %v615_v0 }
 0x75d   :  { %v721_v3 = vpop.f32.mrb[4].mxu1 }
 0x75e   :  { %v722_v4 = vadd.f32 %v907_v2, %v721_v3  ;;  %v956_v5 = vpop.f32.mrb[5].mxu1 }
 0x75f   :  { %v724_v6 = vpop.f32.mrb[6].mxu1 }
 0x760   :  { %v729_v7 = vmul.f32 0.015625, %v722_v4  ;;  %v957_v8 = vpop.f32.mrb[7].mxu1 }
 0x762   :  { %732 = vperm.xlu1 %986, %v729_v7  }
 0x7e1   :  { %v733_v10 = vpop.permute.xlu1 %732 }
 0x7e2   :  { %v735_v11 = vsub.f32 %v722_v4, %v733_v10 }
 0x7e4   :  { %v736_v12 = vmul.f32 %v735_v11, %v735_v11 }
 0x7e6   :  { %v738_v13 = vsel %vm737_vm5, %v736_v12, 0.0 }
 0x7e7   :  { %739 = vadd.xlane.f32.xlu0 %v738_v13 }
 0x874   :  { %v740_v18 = vpop.xlane.xlu0 %739 }
 0x875   :  { %v742_v19 = vmul.f32 0.015625, %v740_v18 }
 0x877   :  { %v743_v20 = vadd.f32 1e-05, %v742_v19 }
 0x879   :  { %1060 = vrsqrt.f32 %v743_v20 }
 0x883   :  { %v1061_v21 = vpop.eup %1060 }
 0x884   :  { %v745_v24 = vmul.f32 %v1061_v21, %v735_v11 }
 0x886   :  { %v752_v26 = vmul.f32 %v916_v23, %v745_v24 }
 0x888   :  { %v759_v27 = vadd.f32 %v917_v25, %v752_v26 }
 0x88a   :  { %vm760_vm6 = vcmp.ge.f32.partialorder %v759_v27, 0.0  ;;  %v761_v28 = vmul.f32 0.1, %v759_v27 }
 0x88c   :  { %v762_v29 = vsel %vm760_vm6, %v759_v27, %v761_v28 }
 0x88d   :  { %v763_v30 = vpack.c.bf16 %v762_v29, %v762_v29 }
 0x88f   :  { %967 = vmatmul.mubr.msk.bf16.vlgmr.msra.gmra.mrb[8].mxu0 %vm737_vm5, %v763_v30 }
 0x962   :  { %v840_v32 = vpop.f32.mrb[8].mxu0 }
 0x963   :  { %v841_v33 = vadd.f32 %v918_v31, %v840_v32  ;;  %v968_v34 = vpop.f32.mrb[9].mxu0 }
 0x964   :  { %v843_v35 = vpop.f32.mrb[10].mxu0 }
 0x965   :  { %846 = vst [vmem:[#allocation11] sm:$0xff] %v841_v33  ;;  %v969_v36 = vpop.f32.mrb[11].mxu0 }
 0x966   :  { %1183 = shalt.err (!%p1180_p2)
}
 0x967   :  { %s1513_s6 = sld [smem:[#allocation21_spill]] }
 0x96d   :  { %s1184_s3 = scalar_lea.hbm %s1513_s6, 128 }
 0x96e   :  { %p1185_p3 = scmp.ne.s32.totalorder %s1513_s6, %s1184_s3  ;;  %p1188_p4 = scmp.lt.u32.totalorder %s1184_s3, %s1513_s6 }
 0x970   :  { %p1190_p5 = pnand %p1188_p4, %p1185_p3 }
 0x972   :  { %1193 = shalt.err (!%p1190_p5)
}
 0x973   :  { %856 = dma.vmem_to_hbm [thread:$0]  %s854_s20, 128, %s1513_s6, [#allocation4]  }
 0x974   :  { %1200 = dma.done.wait [#allocation4], 128  }
 0x975   :  { %1201 = vsyncadd [#allocation4], 4294967168 }
 0x976   :  { %860 = vsyncpa [#allocation3], 1 }
 0x977   :  { %861 = vsyncpa [#allocation6], 1 }
 0x978   :  { %862 = vsyncpa [#allocation9], 1 }
 0x979   :  { %863 = vsyncpa [#allocation4], 1 }

</bundles_post_ra>
